<compile_context>
chip_gen: v7x
topology: tpu7x:2x2x1
jax: 0.10.0
libtpu: 0.0.40
codegen_flags: <defaults>
</compile_context>

<pallas_src>
import jax
import jax.numpy as jnp
from jax.experimental import pallas as pl
from jax.experimental.pallas import tpu as pltpu


# ----------------------------------------------------------------------------
# Deterministic parameter initialization (shapes from Network.__init__).
# Unused by forward() - kept only for interface fidelity with the PyTorch code.
# ----------------------------------------------------------------------------
def init_params(key):
    ks = jax.random.split(key, 10)
    return {
        # conv1: Conv2d(1, 6, kernel_size=5)
        "conv1_w": jax.random.normal(ks[0], (6, 1, 5, 5), jnp.float32) * 0.1,
        "conv1_b": jax.random.normal(ks[1], (6,), jnp.float32) * 0.1,
        # conv2: Conv2d(6, 12, kernel_size=5)
        "conv2_w": jax.random.normal(ks[2], (12, 6, 5, 5), jnp.float32) * 0.1,
        "conv2_b": jax.random.normal(ks[3], (12,), jnp.float32) * 0.1,
        # fc1: Linear(12*4*4, 120)
        "fc1_w": jax.random.normal(ks[4], (120, 12 * 4 * 4), jnp.float32) * 0.1,
        "fc1_b": jax.random.normal(ks[5], (120,), jnp.float32) * 0.1,
        # fc2: Linear(120, 60)
        "fc2_w": jax.random.normal(ks[6], (60, 120), jnp.float32) * 0.1,
        "fc2_b": jax.random.normal(ks[7], (60,), jnp.float32) * 0.1,
        # out: Linear(60, 10)
        "out_w": jax.random.normal(ks[8], (10, 60), jnp.float32) * 0.1,
        "out_b": jax.random.normal(ks[9], (10,), jnp.float32) * 0.1,
    }


# ----------------------------------------------------------------------------
# Pallas kernel: identity copy (the entire forward pass of `Network`).
# ----------------------------------------------------------------------------
def identity_copy_kernel(x_ref, o_ref):
    o_ref[...] = x_ref[...]


_LANES = 512            # last dim: large multiple of 128 -> unmasked vst
_SUBLANES = 8           # (8, 128) tiling granularity for f32
_MAX_BLOCK_ROWS = 1024  # (1024, 512) f32 block = 2 MiB; 4 double-buffered
                        # in/out buffers = 8 MiB < scoped-VMEM default.


def _round_up(x, m):
    return ((x + m - 1) // m) * m


def _identity_pallas(t):
    """Identity copy of `t` through a lane-dense tiled Pallas kernel."""
    orig_shape = t.shape
    n = t.size

    # Lane-dense 2-D slab: (rows, 512), rows a multiple of 8 (sublanes).
    n_pad = _round_up(n, _LANES * _SUBLANES)
    rows = n_pad // _LANES
    padded = n_pad != n

    flat = t.reshape(-1)
    if padded:
        flat = jnp.pad(flat, (0, n_pad - n))
    x2d = flat.reshape(rows, _LANES)

    # Either one full-array block (bypasses the (8,128) divisibility rule) or
    # 1024-row blocks with a ragged, masked last block via a cdiv grid.
    block_rows = min(_MAX_BLOCK_ROWS, rows)
    grid = (pl.cdiv(rows, block_rows),)

    out2d = pl.pallas_call(
        identity_copy_kernel,
        out_shape=jax.ShapeDtypeStruct((rows, _LANES), t.dtype),
        grid=grid,
        in_specs=[pl.BlockSpec((block_rows, _LANES), lambda i: (i, 0))],
        out_specs=pl.BlockSpec((block_rows, _LANES), lambda i: (i, 0)),
        # Alias only the freshly padded slab (never the caller's live buffer).
        input_output_aliases=({0: 0} if padded else {}),
        compiler_params=pltpu.CompilerParams(
            # Every tile is independent -> parallel (enables megacore split).
            dimension_semantics=("parallel",),
        ),
    )(x2d)

    out_flat = out2d.reshape(-1)
    if padded:
        out_flat = out_flat[:n]
    return out_flat.reshape(orig_shape)


@jax.jit
def network_forward(params, t):
    """Forward pass of `Network`: returns t unchanged (identity)."""
    del params  # unused by forward(), matching the PyTorch module
    # TODO(synk): conv/fc layers are defined but never applied by forward();
    # no conv kernels are emitted on purpose.
    return _identity_pallas(t)


if __name__ == "__main__":
    key = jax.random.PRNGKey(0)
    pkey, xkey = jax.random.split(key)

    params = init_params(pkey)

    # NCHW input consistent with conv1's in_channels=1 (classic 28x28 setup).
    x = jax.random.normal(xkey, (2, 1, 28, 28), jnp.float32)

    y = network_forward(params, x)
    y = jax.block_until_ready(y)

    assert y.shape == x.shape and y.dtype == x.dtype
    assert bool(jnp.array_equal(y, x)), "identity forward mismatch"

    print("KERNEL_OK")
</pallas_src>

<mosaic_0001>
module attributes {stable_mosaic.version = 11 : i64} {
  func.func @identity_copy_kernel(%arg0: i32, %arg1: memref<8x512xf32, #tpu.memory_space<vmem>>, %arg2: memref<8x512xf32, #tpu.memory_space<vmem>>) attributes {dimension_semantics = [#tpu.dimension_semantics<parallel>], iteration_bounds = array<i64: 1>, scalar_prefetch = 0 : i64, scratch_operands = 0 : i64, tpu.core_type = #tpu.core_type<tc>, window_params = [{transform_indices = @transform_0, window_bounds = array<i64: 8, 512>}, {transform_indices = @transform_1, window_bounds = array<i64: 8, 512>}]} {
    %c0 = arith.constant 0 : index
    %c0_0 = arith.constant 0 : index
    %0 = vector.load %arg1[%c0, %c0_0] : memref<8x512xf32, #tpu.memory_space<vmem>>, vector<8x512xf32>
    %c0_1 = arith.constant 0 : index
    %c0_2 = arith.constant 0 : index
    %1 = vector.load %arg2[%c0_1, %c0_2] : memref<8x512xf32, #tpu.memory_space<vmem>>, vector<8x512xf32>
    tpu.vector_store %arg2[%c0_1, %c0_2], %0 {strides = array<i32>} : memref<8x512xf32, #tpu.memory_space<vmem>>, vector<8x512xf32>,
    return
  }
  func.func @transform_0(%arg0: i32) -> (i32, i32) {
    %c0_i32 = arith.constant 0 : i32
    %c0_i32_0 = arith.constant 0 : i32
    return %arg0, %c0_i32 : i32, i32
  }
  func.func @transform_1(%arg0: i32) -> (i32, i32) {
    %c0_i32 = arith.constant 0 : i32
    %c0_i32_0 = arith.constant 0 : i32
    return %arg0, %c0_i32 : i32, i32
  }
}

</mosaic_0001>

<bundles_post_ra>
// kernel: network_forward.1
= control target key start
LH: loop header
LB: loop body
LE: loop exit
PB: predicated region body
PF: predicated region fallthrough
CT: control target
= control target key end

     0   :  { %s54_s0 = inlined_call_operand.vmem [shape: f32[8,512], index: 0, kind: input, shape index: {}, may-alias: {0,1}]   ;;  %s55_s1 = inlined_call_operand.vmem [shape: f32[8,512], index: 1, kind: output, shape index: {}, may-alias: {0,1}]  }
   0x1   :  { %v8_v0 = vld [vmem:[%s54_s0] sm:$0xff]  ;;  %v9_v1 = vld [vmem:[%s54_s0 + $0x8] sm:$0xff]  ;;  %v10_v2 = vld [vmem:[%s54_s0 + $0x10] sm:$0xff] }
   0x2   :  { %12 = vst [vmem:[%s55_s1] sm:$0xff] %v8_v0  ;;  %13 = vst [vmem:[%s55_s1 + $0x8] sm:$0xff] %v9_v1 }
   0x3   :  { %14 = vst [vmem:[%s55_s1 + $0x10] sm:$0xff] %v10_v2 }
   0xa   :  { %v11_v3 = vld [vmem:[%s54_s0 + $0x18] sm:$0xff] }
   0xb   :  { %15 = vst [vmem:[%s55_s1 + $0x18] sm:$0xff] %v11_v3 }

</bundles_post_ra>
